<compile_context>
chip_gen: v7x
topology: tpu7x:2x2x1
jax: 0.10.0
libtpu: 0.0.40
codegen_flags: <defaults>
</compile_context>

<pallas_src>
import functools

import jax
import jax.numpy as jnp
from jax.experimental import pallas as pl
from jax.experimental.pallas import tpu as pltpu


def _round_up(v, m):
    return (v + m - 1) // m * m


def _layer_norm(h, gamma, beta, lane_mask, d_real, eps=1e-5):
    """LayerNorm over the last axis, ignoring padded lanes (columns >= d_real)."""
    inv_d = 1.0 / float(d_real)
    if lane_mask is None:
        mean = jnp.sum(h, axis=-1, keepdims=True) * inv_d
        centered = h - mean
        var = jnp.sum(centered * centered, axis=-1, keepdims=True) * inv_d
    else:
        hm = jnp.where(lane_mask, h, 0.0)
        mean = jnp.sum(hm, axis=-1, keepdims=True) * inv_d
        centered = jnp.where(lane_mask, h - mean, 0.0)
        var = jnp.sum(centered * centered, axis=-1, keepdims=True) * inv_d
    return centered * jax.lax.rsqrt(var + eps) * gamma + beta


def encoder_kernel(x_ref,
                   wq_ref, bq_ref, wk_ref, bk_ref, wv_ref, bv_ref,
                   w1_ref, b1_ref, w2_ref, b2_ref,
                   g1_ref, be1_ref, g2_ref, be2_ref,
                   o_ref, *, n_real, d_real, tm):
    i = pl.program_id(0)
    row0 = pl.multiple_of(i * tm, tm)

    x_full = x_ref[...]                         # [Np, Dp] full sequence (keys / values source)
    xq = x_ref[pl.ds(row0, tm), :]              # [tm, Dp] query rows for this grid step
    n_pad, d_pad = x_full.shape

    # --- Self attention (weights are pre-transposed: [in, out]) --------------
    q = jnp.dot(xq, wq_ref[...], preferred_element_type=jnp.float32) + bq_ref[...]
    k = jnp.dot(x_full, wk_ref[...], preferred_element_type=jnp.float32) + bk_ref[...]
    v = jnp.dot(x_full, wv_ref[...], preferred_element_type=jnp.float32) + bv_ref[...]

    # scores: contract the feature dim of q and k directly (no materialized k.T)
    s = jax.lax.dot_general(q, k, dimension_numbers=(((1,), (1,)), ((), ())),
                            preferred_element_type=jnp.float32)
    s = s * (1.0 / float(d_real) ** 0.5)

    if n_pad != n_real:  # mask padded key rows out of the softmax (static branch)
        key_idx = jax.lax.broadcasted_iota(jnp.int32, s.shape, 1)
        s = jnp.where(key_idx < n_real, s, -1e30)

    # softmax with deferred normalization
    s_max = jnp.max(s, axis=-1, keepdims=True)
    p = jnp.exp(s - s_max)
    l = jnp.sum(p, axis=-1, keepdims=True)
    attn = jnp.dot(p, v, preferred_element_type=jnp.float32)     # [tm, Dp]
    r = pl.reciprocal(l, approx=True)
    r = r * (2.0 - l * r)          # one Newton step: EUP path, restores f32-level accuracy
    attn = attn * r

    lane_mask = None
    if d_pad != d_real:            # static branch: only emitted when features are padded
        lane = jax.lax.broadcasted_iota(jnp.int32, (1, d_pad), 1)
        lane_mask = lane < d_real

    # --- Residual + LayerNorm 1 (dropout == identity) ------------------------
    h1 = _layer_norm(xq + attn, g1_ref[...], be1_ref[...], lane_mask, d_real)

    # --- Feed-forward ---------------------------------------------------------
    ff = jnp.dot(h1, w1_ref[...], preferred_element_type=jnp.float32) + b1_ref[...]
    ff = jnp.maximum(ff, 0.0)                                     # ReLU
    ff = jnp.dot(ff, w2_ref[...], preferred_element_type=jnp.float32) + b2_ref[...]

    # --- Residual + LayerNorm 2 -----------------------------------------------
    h2 = _layer_norm(h1 + ff, g2_ref[...], be2_ref[...], lane_mask, d_real)

    # --- Outer residual ---------------------------------------------------------
    o_ref[...] = (h2 + xq).astype(o_ref.dtype)


@jax.jit
def transformer_encoder(x, params):
    N, D = x.shape
    f32 = jnp.float32

    Dp = _round_up(max(D, 128), 128)     # lane-dense feature dim (unmasked vst on output)
    Np0 = _round_up(N, 8)
    tm = min(Np0, 128)                   # query-row tile; "parallel" grid axis
    Np = _round_up(Np0, tm)

    def pad2(a, r, c):
        a = a.astype(f32)
        return jnp.pad(a, ((0, r - a.shape[0]), (0, c - a.shape[1])))

    def row(v, c):                        # 1-D param -> zero-padded [1, c]
        v = v.astype(f32).reshape(1, -1)
        return jnp.pad(v, ((0, 0), (0, c - v.shape[1])))

    xp = pad2(x, Np, Dp)
    # nn.Linear stores W as [out, in]; pre-transpose in the wrapper so the kernel never
    # issues an in-kernel transpose.
    wq = pad2(params["wq"].T, Dp, Dp); bq = row(params["bq"], Dp)
    wk = pad2(params["wk"].T, Dp, Dp); bk = row(params["bk"], Dp)
    wv = pad2(params["wv"].T, Dp, Dp); bv = row(params["bv"], Dp)
    w1 = pad2(params["w1"].T, Dp, Dp); b1 = row(params["b1"], Dp)
    w2 = pad2(params["w2"].T, Dp, Dp); b2 = row(params["b2"], Dp)
    g1 = row(params["g1"], Dp); be1 = row(params["be1"], Dp)
    g2 = row(params["g2"], Dp); be2 = row(params["be2"], Dp)

    args = (xp, wq, bq, wk, bk, wv, bv, w1, b1, w2, b2, g1, be1, g2, be2)

    def resident_spec(shape):
        # Full-array block; index_map returns constants so the array stays
        # VMEM-resident across the row grid (no per-step re-DMA).
        return pl.BlockSpec(shape, lambda i: (0, 0))

    in_specs = [resident_spec(a.shape) for a in args]
    out_spec = pl.BlockSpec((tm, Dp), lambda i: (i, 0))

    flops = 2 * Np * Dp * Dp * 5 + 4 * Np * Np * Dp
    bytes_accessed = 4 * (2 * Np * Dp + 5 * Dp * Dp + 9 * Dp)
    cost = pl.CostEstimate(flops=flops, transcendentals=Np * Np,
                           bytes_accessed=bytes_accessed)

    kernel = functools.partial(encoder_kernel, n_real=N, d_real=D, tm=tm)
    out = pl.pallas_call(
        kernel,
        out_shape=jax.ShapeDtypeStruct((Np, Dp), jnp.float32),
        grid=(Np // tm,),
        in_specs=in_specs,
        out_specs=out_spec,
        compiler_params=pltpu.CompilerParams(
            dimension_semantics=("parallel",),
            # 32 MiB is within the scoped default on v5e/v6e/v7x and leaves headroom.
            vmem_limit_bytes=32 * 1024 * 1024,
        ),
        cost_estimate=cost,
    )(*args)
    return out[:N, :D]


def make_params(key, d):
    ks = jax.random.split(key, 5)

    def lin(k, out_dim, in_dim):
        bound = 1.0 / jnp.sqrt(jnp.float32(in_dim))
        kw, kb = jax.random.split(k)
        w = jax.random.uniform(kw, (out_dim, in_dim), jnp.float32, -bound, bound)
        b = jax.random.uniform(kb, (out_dim,), jnp.float32, -bound, bound)
        return w, b

    wq, bq = lin(ks[0], d, d)
    wk, bk = lin(ks[1], d, d)
    wv, bv = lin(ks[2], d, d)
    w1, b1 = lin(ks[3], d, d)
    w2, b2 = lin(ks[4], d, d)
    return {
        "wq": wq, "bq": bq, "wk": wk, "bk": bk, "wv": wv, "bv": bv,
        "w1": w1, "b1": b1, "w2": w2, "b2": b2,
        "g1": jnp.ones((d,), jnp.float32), "be1": jnp.zeros((d,), jnp.float32),
        "g2": jnp.ones((d,), jnp.float32), "be2": jnp.zeros((d,), jnp.float32),
    }


def reference(x, p):
    def ln(h, g, b, eps=1e-5):
        m = h.mean(-1, keepdims=True)
        v = ((h - m) ** 2).mean(-1, keepdims=True)
        return (h - m) / jnp.sqrt(v + eps) * g + b

    q = x @ p["wq"].T + p["bq"]
    k = x @ p["wk"].T + p["bk"]
    v = x @ p["wv"].T + p["bv"]
    a = jax.nn.softmax(q @ k.T / jnp.sqrt(jnp.float32(x.shape[-1])), axis=-1)
    attn = a @ v
    h1 = ln(x + attn, p["g1"], p["be1"])
    ff = jnp.maximum(h1 @ p["w1"].T + p["b1"], 0.0) @ p["w2"].T + p["b2"]
    h2 = ln(h1 + ff, p["g2"], p["be2"])
    return h2 + x


if __name__ == "__main__":
    key = jax.random.PRNGKey(0)
    kx, kp = jax.random.split(key)
    N, D = 8, 32                     # seq=8, hidden=32 (input_dim==hidden_dim==output_dim)
    x = jax.random.normal(kx, (N, D), jnp.float32)
    params = make_params(kp, D)

    out = transformer_encoder(x, params)
    out = jax.block_until_ready(out)

    ref = reference(x, params)
    assert out.shape == (N, D)
    err = float(jnp.max(jnp.abs(out - ref)))
    assert jnp.allclose(out, ref, atol=1e-4, rtol=1e-4), err
    print("KERNEL_OK")
</pallas_src>

<mosaic_0001>
module attributes {stable_mosaic.version = 11 : i64} {
  func.func @encoder_kernel(%arg0: i32, %arg1: memref<8x128xf32, #tpu.memory_space<vmem>>, %arg2: memref<128x128xf32, #tpu.memory_space<vmem>>, %arg3: memref<1x128xf32, #tpu.memory_space<vmem>>, %arg4: memref<128x128xf32, #tpu.memory_space<vmem>>, %arg5: memref<1x128xf32, #tpu.memory_space<vmem>>, %arg6: memref<128x128xf32, #tpu.memory_space<vmem>>, %arg7: memref<1x128xf32, #tpu.memory_space<vmem>>, %arg8: memref<128x128xf32, #tpu.memory_space<vmem>>, %arg9: memref<1x128xf32, #tpu.memory_space<vmem>>, %arg10: memref<128x128xf32, #tpu.memory_space<vmem>>, %arg11: memref<1x128xf32, #tpu.memory_space<vmem>>, %arg12: memref<1x128xf32, #tpu.memory_space<vmem>>, %arg13: memref<1x128xf32, #tpu.memory_space<vmem>>, %arg14: memref<1x128xf32, #tpu.memory_space<vmem>>, %arg15: memref<1x128xf32, #tpu.memory_space<vmem>>, %arg16: memref<8x128xf32, #tpu.memory_space<vmem>>) attributes {dimension_semantics = [#tpu.dimension_semantics<parallel>], iteration_bounds = array<i64: 1>, scalar_prefetch = 0 : i64, scratch_operands = 0 : i64, tpu.core_type = #tpu.core_type<tc>, window_params = [{pipeline_mode = #tpu.pipeline_mode<synchronous>, transform_indices = @transform_0, window_bounds = array<i64: 8, 128>}, {pipeline_mode = #tpu.pipeline_mode<synchronous>, transform_indices = @transform_1, window_bounds = array<i64: 128, 128>}, {pipeline_mode = #tpu.pipeline_mode<synchronous>, transform_indices = @transform_2, window_bounds = array<i64: 1, 128>}, {pipeline_mode = #tpu.pipeline_mode<synchronous>, transform_indices = @transform_3, window_bounds = array<i64: 128, 128>}, {pipeline_mode = #tpu.pipeline_mode<synchronous>, transform_indices = @transform_4, window_bounds = array<i64: 1, 128>}, {pipeline_mode = #tpu.pipeline_mode<synchronous>, transform_indices = @transform_5, window_bounds = array<i64: 128, 128>}, {pipeline_mode = #tpu.pipeline_mode<synchronous>, transform_indices = @transform_6, window_bounds = array<i64: 1, 128>}, {pipeline_mode = #tpu.pipeline_mode<synchronous>, transform_indices = @transform_7, window_bounds = array<i64: 128, 128>}, {pipeline_mode = #tpu.pipeline_mode<synchronous>, transform_indices = @transform_8, window_bounds = array<i64: 1, 128>}, {pipeline_mode = #tpu.pipeline_mode<synchronous>, transform_indices = @transform_9, window_bounds = array<i64: 128, 128>}, {pipeline_mode = #tpu.pipeline_mode<synchronous>, transform_indices = @transform_10, window_bounds = array<i64: 1, 128>}, {pipeline_mode = #tpu.pipeline_mode<synchronous>, transform_indices = @transform_11, window_bounds = array<i64: 1, 128>}, {pipeline_mode = #tpu.pipeline_mode<synchronous>, transform_indices = @transform_12, window_bounds = array<i64: 1, 128>}, {pipeline_mode = #tpu.pipeline_mode<synchronous>, transform_indices = @transform_13, window_bounds = array<i64: 1, 128>}, {pipeline_mode = #tpu.pipeline_mode<synchronous>, transform_indices = @transform_14, window_bounds = array<i64: 1, 128>}, {transform_indices = @transform_15, window_bounds = array<i64: 8, 128>}]} {
    %c8_i32 = arith.constant 8 : i32
    %0 = arith.muli %arg0, %c8_i32 : i32
    %1 = tpu.assume_multiple %0, 8 : i32
    %c0 = arith.constant 0 : index
    %c0_0 = arith.constant 0 : index
    %2 = vector.load %arg1[%c0, %c0_0] : memref<8x128xf32, #tpu.memory_space<vmem>>, vector<8x128xf32>
    %3 = arith.index_cast %1 : i32 to index
    %c0_1 = arith.constant 0 : index
    %4 = vector.load %arg1[%3, %c0_1] : memref<8x128xf32, #tpu.memory_space<vmem>>, vector<8x128xf32>
    %c0_2 = arith.constant 0 : index
    %c0_3 = arith.constant 0 : index
    %5 = vector.load %arg2[%c0_2, %c0_3] : memref<128x128xf32, #tpu.memory_space<vmem>>, vector<128x128xf32>
    %cst = arith.constant dense<0.000000e+00> : vector<8x128xf32>
    %6 = tpu.matmul %4, %5, %cst {dimension_numbers = #tpu.dot_dimension_numbers<[1], [0], [0], [1], [0, 0, 1, 1], [], []>} : vector<8x128xf32>, vector<128x128xf32>, vector<8x128xf32> -> vector<8x128xf32>
    %c0_4 = arith.constant 0 : index
    %c0_5 = arith.constant 0 : index
    %7 = vector.load %arg3[%c0_4, %c0_5] : memref<1x128xf32, #tpu.memory_space<vmem>>, vector<1x128xf32>
    %8 = vector.broadcast %7 : vector<1x128xf32> to vector<8x128xf32>
    %9 = arith.addf %6, %8 : vector<8x128xf32>
    %c0_6 = arith.constant 0 : index
    %c0_7 = arith.constant 0 : index
    %10 = vector.load %arg4[%c0_6, %c0_7] : memref<128x128xf32, #tpu.memory_space<vmem>>, vector<128x128xf32>
    %cst_8 = arith.constant dense<0.000000e+00> : vector<8x128xf32>
    %11 = tpu.matmul %2, %10, %cst_8 {dimension_numbers = #tpu.dot_dimension_numbers<[1], [0], [0], [1], [0, 0, 1, 1], [], []>} : vector<8x128xf32>, vector<128x128xf32>, vector<8x128xf32> -> vector<8x128xf32>
    %c0_9 = arith.constant 0 : index
    %c0_10 = arith.constant 0 : index
    %12 = vector.load %arg5[%c0_9, %c0_10] : memref<1x128xf32, #tpu.memory_space<vmem>>, vector<1x128xf32>
    %13 = vector.broadcast %12 : vector<1x128xf32> to vector<8x128xf32>
    %14 = arith.addf %11, %13 : vector<8x128xf32>
    %c0_11 = arith.constant 0 : index
    %c0_12 = arith.constant 0 : index
    %15 = vector.load %arg6[%c0_11, %c0_12] : memref<128x128xf32, #tpu.memory_space<vmem>>, vector<128x128xf32>
    %cst_13 = arith.constant dense<0.000000e+00> : vector<8x128xf32>
    %16 = tpu.matmul %2, %15, %cst_13 {dimension_numbers = #tpu.dot_dimension_numbers<[1], [0], [0], [1], [0, 0, 1, 1], [], []>} : vector<8x128xf32>, vector<128x128xf32>, vector<8x128xf32> -> vector<8x128xf32>
    %c0_14 = arith.constant 0 : index
    %c0_15 = arith.constant 0 : index
    %17 = vector.load %arg7[%c0_14, %c0_15] : memref<1x128xf32, #tpu.memory_space<vmem>>, vector<1x128xf32>
    %18 = vector.broadcast %17 : vector<1x128xf32> to vector<8x128xf32>
    %19 = arith.addf %16, %18 : vector<8x128xf32>
    %cst_16 = arith.constant dense<0.000000e+00> : vector<8x8xf32>
    %20 = tpu.matmul %9, %14, %cst_16 {dimension_numbers = #tpu.dot_dimension_numbers<[1], [1], [0], [0], [0, 0, 1, 0], [], []>} : vector<8x128xf32>, vector<8x128xf32>, vector<8x8xf32> -> vector<8x8xf32>
    %cst_17 = arith.constant 0.176776692 : f32
    %21 = vector.broadcast %cst_17 : f32 to vector<8x8xf32>
    %22 = arith.mulf %20, %21 : vector<8x8xf32>
    %cst_18 = arith.constant dense<0xFF800000> : vector<8xf32>
    %23 = vector.multi_reduction <maximumf>, %22, %cst_18 [1] : vector<8x8xf32> to vector<8xf32>
    %24 = vector.shape_cast %23 : vector<8xf32> to vector<8x1xf32>
    %25 = vector.broadcast %24 : vector<8x1xf32> to vector<8x8xf32>
    %26 = arith.subf %22, %25 : vector<8x8xf32>
    %27 = math.exp %26 : vector<8x8xf32>
    %cst_19 = arith.constant dense<0.000000e+00> : vector<8xf32>
    %28 = vector.multi_reduction <add>, %27, %cst_19 [1] : vector<8x8xf32> to vector<8xf32>
    %29 = vector.shape_cast %28 : vector<8xf32> to vector<8x1xf32>
    %cst_20 = arith.constant dense<0.000000e+00> : vector<8x128xf32>
    %30 = tpu.matmul %27, %19, %cst_20 {dimension_numbers = #tpu.dot_dimension_numbers<[1], [0], [0], [1], [0, 0, 1, 1], [], []>} : vector<8x8xf32>, vector<8x128xf32>, vector<8x128xf32> -> vector<8x128xf32>
    %31 = tpu.reciprocal %29 {approx = true} : vector<8x1xf32> -> vector<8x1xf32>
    %32 = arith.mulf %29, %31 : vector<8x1xf32>
    %cst_21 = arith.constant 2.000000e+00 : f32
    %33 = vector.broadcast %cst_21 : f32 to vector<8x1xf32>
    %34 = arith.subf %33, %32 : vector<8x1xf32>
    %35 = arith.mulf %31, %34 : vector<8x1xf32>
    %36 = vector.broadcast %35 : vector<8x1xf32> to vector<8x128xf32>
    %37 = arith.mulf %30, %36 : vector<8x128xf32>
    %38 = tpu.iota {dimensions = array<i32: 1>} : vector<1x128xi32>
    %c32_i32 = arith.constant 32 : i32
    %39 = vector.broadcast %c32_i32 : i32 to vector<1x128xi32>
    %40 = arith.cmpi slt, %38, %39 : vector<1x128xi32>
    %41 = arith.addf %4, %37 : vector<8x128xf32>
    %c0_22 = arith.constant 0 : index
    %c0_23 = arith.constant 0 : index
    %42 = vector.load %arg12[%c0_22, %c0_23] : memref<1x128xf32, #tpu.memory_space<vmem>>, vector<1x128xf32>
    %c0_24 = arith.constant 0 : index
    %c0_25 = arith.constant 0 : index
    %43 = vector.load %arg13[%c0_24, %c0_25] : memref<1x128xf32, #tpu.memory_space<vmem>>, vector<1x128xf32>
    %cst_26 = arith.constant 0.000000e+00 : f32
    %44 = vector.shape_cast %40 : vector<1x128xi1> to vector<1x128xi1>
    %45 = vector.broadcast %44 : vector<1x128xi1> to vector<8x128xi1>
    %46 = vector.broadcast %cst_26 : f32 to vector<8x128xf32>
    %47 = arith.select %45, %41, %46 : vector<8x128xi1>, vector<8x128xf32>
    %cst_27 = arith.constant dense<0.000000e+00> : vector<8xf32>
    %48 = vector.multi_reduction <add>, %47, %cst_27 [1] : vector<8x128xf32> to vector<8xf32>
    %49 = vector.shape_cast %48 : vector<8xf32> to vector<8x1xf32>
    %cst_28 = arith.constant 3.125000e-02 : f32
    %50 = vector.broadcast %cst_28 : f32 to vector<8x1xf32>
    %51 = arith.mulf %49, %50 : vector<8x1xf32>
    %52 = vector.broadcast %51 : vector<8x1xf32> to vector<8x128xf32>
    %53 = arith.subf %41, %52 : vector<8x128xf32>
    %cst_29 = arith.constant 0.000000e+00 : f32
    %54 = vector.shape_cast %40 : vector<1x128xi1> to vector<1x128xi1>
    %55 = vector.broadcast %54 : vector<1x128xi1> to vector<8x128xi1>
    %56 = vector.broadcast %cst_29 : f32 to vector<8x128xf32>
    %57 = arith.select %55, %53, %56 : vector<8x128xi1>, vector<8x128xf32>
    %58 = arith.mulf %57, %57 : vector<8x128xf32>
    %cst_30 = arith.constant dense<0.000000e+00> : vector<8xf32>
    %59 = vector.multi_reduction <add>, %58, %cst_30 [1] : vector<8x128xf32> to vector<8xf32>
    %60 = vector.shape_cast %59 : vector<8xf32> to vector<8x1xf32>
    %cst_31 = arith.constant 3.125000e-02 : f32
    %61 = vector.broadcast %cst_31 : f32 to vector<8x1xf32>
    %62 = arith.mulf %60, %61 : vector<8x1xf32>
    %cst_32 = arith.constant 9.99999974E-6 : f32
    %63 = vector.broadcast %cst_32 : f32 to vector<8x1xf32>
    %64 = arith.addf %62, %63 : vector<8x1xf32>
    %65 = math.rsqrt %64 : vector<8x1xf32>
    %66 = vector.broadcast %65 : vector<8x1xf32> to vector<8x128xf32>
    %67 = arith.mulf %57, %66 : vector<8x128xf32>
    %68 = vector.broadcast %42 : vector<1x128xf32> to vector<8x128xf32>
    %69 = arith.mulf %67, %68 : vector<8x128xf32>
    %70 = vector.broadcast %43 : vector<1x128xf32> to vector<8x128xf32>
    %71 = arith.addf %69, %70 : vector<8x128xf32>
    %c0_33 = arith.constant 0 : index
    %c0_34 = arith.constant 0 : index
    %72 = vector.load %arg8[%c0_33, %c0_34] : memref<128x128xf32, #tpu.memory_space<vmem>>, vector<128x128xf32>
    %cst_35 = arith.constant dense<0.000000e+00> : vector<8x128xf32>
    %73 = tpu.matmul %71, %72, %cst_35 {dimension_numbers = #tpu.dot_dimension_numbers<[1], [0], [0], [1], [0, 0, 1, 1], [], []>} : vector<8x128xf32>, vector<128x128xf32>, vector<8x128xf32> -> vector<8x128xf32>
    %c0_36 = arith.constant 0 : index
    %c0_37 = arith.constant 0 : index
    %74 = vector.load %arg9[%c0_36, %c0_37] : memref<1x128xf32, #tpu.memory_space<vmem>>, vector<1x128xf32>
    %75 = vector.broadcast %74 : vector<1x128xf32> to vector<8x128xf32>
    %76 = arith.addf %73, %75 : vector<8x128xf32>
    %cst_38 = arith.constant 0.000000e+00 : f32
    %77 = vector.broadcast %cst_38 : f32 to vector<8x128xf32>
    %78 = arith.maximumf %76, %77 : vector<8x128xf32>
    %c0_39 = arith.constant 0 : index
    %c0_40 = arith.constant 0 : index
    %79 = vector.load %arg10[%c0_39, %c0_40] : memref<128x128xf32, #tpu.memory_space<vmem>>, vector<128x128xf32>
    %cst_41 = arith.constant dense<0.000000e+00> : vector<8x128xf32>
    %80 = tpu.matmul %78, %79, %cst_41 {dimension_numbers = #tpu.dot_dimension_numbers<[1], [0], [0], [1], [0, 0, 1, 1], [], []>} : vector<8x128xf32>, vector<128x128xf32>, vector<8x128xf32> -> vector<8x128xf32>
    %c0_42 = arith.constant 0 : index
    %c0_43 = arith.constant 0 : index
    %81 = vector.load %arg11[%c0_42, %c0_43] : memref<1x128xf32, #tpu.memory_space<vmem>>, vector<1x128xf32>
    %82 = vector.broadcast %81 : vector<1x128xf32> to vector<8x128xf32>
    %83 = arith.addf %80, %82 : vector<8x128xf32>
    %84 = arith.addf %71, %83 : vector<8x128xf32>
    %c0_44 = arith.constant 0 : index
    %c0_45 = arith.constant 0 : index
    %85 = vector.load %arg14[%c0_44, %c0_45] : memref<1x128xf32, #tpu.memory_space<vmem>>, vector<1x128xf32>
    %c0_46 = arith.constant 0 : index
    %c0_47 = arith.constant 0 : index
    %86 = vector.load %arg15[%c0_46, %c0_47] : memref<1x128xf32, #tpu.memory_space<vmem>>, vector<1x128xf32>
    %cst_48 = arith.constant 0.000000e+00 : f32
    %87 = vector.shape_cast %40 : vector<1x128xi1> to vector<1x128xi1>
    %88 = vector.broadcast %87 : vector<1x128xi1> to vector<8x128xi1>
    %89 = vector.broadcast %cst_48 : f32 to vector<8x128xf32>
    %90 = arith.select %88, %84, %89 : vector<8x128xi1>, vector<8x128xf32>
    %cst_49 = arith.constant dense<0.000000e+00> : vector<8xf32>
    %91 = vector.multi_reduction <add>, %90, %cst_49 [1] : vector<8x128xf32> to vector<8xf32>
    %92 = vector.shape_cast %91 : vector<8xf32> to vector<8x1xf32>
    %cst_50 = arith.constant 3.125000e-02 : f32
    %93 = vector.broadcast %cst_50 : f32 to vector<8x1xf32>
    %94 = arith.mulf %92, %93 : vector<8x1xf32>
    %95 = vector.broadcast %94 : vector<8x1xf32> to vector<8x128xf32>
    %96 = arith.subf %84, %95 : vector<8x128xf32>
    %cst_51 = arith.constant 0.000000e+00 : f32
    %97 = vector.shape_cast %40 : vector<1x128xi1> to vector<1x128xi1>
    %98 = vector.broadcast %97 : vector<1x128xi1> to vector<8x128xi1>
    %99 = vector.broadcast %cst_51 : f32 to vector<8x128xf32>
    %100 = arith.select %98, %96, %99 : vector<8x128xi1>, vector<8x128xf32>
    %101 = arith.mulf %100, %100 : vector<8x128xf32>
    %cst_52 = arith.constant dense<0.000000e+00> : vector<8xf32>
    %102 = vector.multi_reduction <add>, %101, %cst_52 [1] : vector<8x128xf32> to vector<8xf32>
    %103 = vector.shape_cast %102 : vector<8xf32> to vector<8x1xf32>
    %cst_53 = arith.constant 3.125000e-02 : f32
    %104 = vector.broadcast %cst_53 : f32 to vector<8x1xf32>
    %105 = arith.mulf %103, %104 : vector<8x1xf32>
    %cst_54 = arith.constant 9.99999974E-6 : f32
    %106 = vector.broadcast %cst_54 : f32 to vector<8x1xf32>
    %107 = arith.addf %105, %106 : vector<8x1xf32>
    %108 = math.rsqrt %107 : vector<8x1xf32>
    %109 = vector.broadcast %108 : vector<8x1xf32> to vector<8x128xf32>
    %110 = arith.mulf %100, %109 : vector<8x128xf32>
    %111 = vector.broadcast %85 : vector<1x128xf32> to vector<8x128xf32>
    %112 = arith.mulf %110, %111 : vector<8x128xf32>
    %113 = vector.broadcast %86 : vector<1x128xf32> to vector<8x128xf32>
    %114 = arith.addf %112, %113 : vector<8x128xf32>
    %115 = arith.addf %114, %4 : vector<8x128xf32>
    %c0_55 = arith.constant 0 : index
    %c0_56 = arith.constant 0 : index
    %116 = vector.load %arg16[%c0_55, %c0_56] : memref<8x128xf32, #tpu.memory_space<vmem>>, vector<8x128xf32>
    tpu.vector_store %arg16[%c0_55, %c0_56], %115 {strides = array<i32>} : memref<8x128xf32, #tpu.memory_space<vmem>>, vector<8x128xf32>,
    return
  }
  func.func @transform_0(%arg0: i32) -> (i32, i32) {
    %c0_i32 = arith.constant 0 : i32
    %c0_i32_0 = arith.constant 0 : i32
    %c0_i32_1 = arith.constant 0 : i32
    return %c0_i32, %c0_i32_0 : i32, i32
  }
  func.func @transform_1(%arg0: i32) -> (i32, i32) {
    %c0_i32 = arith.constant 0 : i32
    %c0_i32_0 = arith.constant 0 : i32
    %c0_i32_1 = arith.constant 0 : i32
    return %c0_i32, %c0_i32_0 : i32, i32
  }
  func.func @transform_2(%arg0: i32) -> (i32, i32) {
    %c0_i32 = arith.constant 0 : i32
    %c0_i32_0 = arith.constant 0 : i32
    %c0_i32_1 = arith.constant 0 : i32
    return %c0_i32, %c0_i32_0 : i32, i32
  }
  func.func @transform_3(%arg0: i32) -> (i32, i32) {
    %c0_i32 = arith.constant 0 : i32
    %c0_i32_0 = arith.constant 0 : i32
    %c0_i32_1 = arith.constant 0 : i32
    return %c0_i32, %c0_i32_0 : i32, i32
  }
  func.func @transform_4(%arg0: i32) -> (i32, i32) {
    %c0_i32 = arith.constant 0 : i32
    %c0_i32_0 = arith.constant 0 : i32
    %c0_i32_1 = arith.constant 0 : i32
    return %c0_i32, %c0_i32_0 : i32, i32
  }
  func.func @transform_5(%arg0: i32) -> (i32, i32) {
    %c0_i32 = arith.constant 0 : i32
    %c0_i32_0 = arith.constant 0 : i32
    %c0_i32_1 = arith.constant 0 : i32
    return %c0_i32, %c0_i32_0 : i32, i32
  }
  func.func @transform_6(%arg0: i32) -> (i32, i32) {
    %c0_i32 = arith.constant 0 : i32
    %c0_i32_0 = arith.constant 0 : i32
    %c0_i32_1 = arith.constant 0 : i32
    return %c0_i32, %c0_i32_0 : i32, i32
  }
  func.func @transform_7(%arg0: i32) -> (i32, i32) {
    %c0_i32 = arith.constant 0 : i32
    %c0_i32_0 = arith.constant 0 : i32
    %c0_i32_1 = arith.constant 0 : i32
    return %c0_i32, %c0_i32_0 : i32, i32
  }
  func.func @transform_8(%arg0: i32) -> (i32, i32) {
    %c0_i32 = arith.constant 0 : i32
    %c0_i32_0 = arith.constant 0 : i32
    %c0_i32_1 = arith.constant 0 : i32
    return %c0_i32, %c0_i32_0 : i32, i32
  }
  func.func @transform_9(%arg0: i32) -> (i32, i32) {
    %c0_i32 = arith.constant 0 : i32
    %c0_i32_0 = arith.constant 0 : i32
    %c0_i32_1 = arith.constant 0 : i32
    return %c0_i32, %c0_i32_0 : i32, i32
  }
  func.func @transform_10(%arg0: i32) -> (i32, i32) {
    %c0_i32 = arith.constant 0 : i32
    %c0_i32_0 = arith.constant 0 : i32
    %c0_i32_1 = arith.constant 0 : i32
    return %c0_i32, %c0_i32_0 : i32, i32
  }
  func.func @transform_11(%arg0: i32) -> (i32, i32) {
    %c0_i32 = arith.constant 0 : i32
    %c0_i32_0 = arith.constant 0 : i32
    %c0_i32_1 = arith.constant 0 : i32
    return %c0_i32, %c0_i32_0 : i32, i32
  }
  func.func @transform_12(%arg0: i32) -> (i32, i32) {
    %c0_i32 = arith.constant 0 : i32
    %c0_i32_0 = arith.constant 0 : i32
    %c0_i32_1 = arith.constant 0 : i32
    return %c0_i32, %c0_i32_0 : i32, i32
  }
  func.func @transform_13(%arg0: i32) -> (i32, i32) {
    %c0_i32 = arith.constant 0 : i32
    %c0_i32_0 = arith.constant 0 : i32
    %c0_i32_1 = arith.constant 0 : i32
    return %c0_i32, %c0_i32_0 : i32, i32
  }
  func.func @transform_14(%arg0: i32) -> (i32, i32) {
    %c0_i32 = arith.constant 0 : i32
    %c0_i32_0 = arith.constant 0 : i32
    %c0_i32_1 = arith.constant 0 : i32
    return %c0_i32, %c0_i32_0 : i32, i32
  }
  func.func @transform_15(%arg0: i32) -> (i32, i32) {
    %c0_i32 = arith.constant 0 : i32
    %c0_i32_0 = arith.constant 0 : i32
    return %arg0, %c0_i32 : i32, i32
  }
}

</mosaic_0001>

<bundles_post_ra>
// kernel: transformer_encoder.1
= control target key start
LH: loop header
LB: loop body
LE: loop exit
PB: predicated region body
PF: predicated region fallthrough
CT: control target
= control target key end

     0   :  { %v1201_v3 = vmov 0.0|0.0   ;;  %vm1202_vm0 = vmmov 0   ;;  %v1203_v11 = vmov 0.0   ;;  %s1649_s0 = inlined_call_operand.vmem [shape: f32[8,128], index: 0, kind: input, shape index: {}]   ;;  %s1650_s1 = inlined_call_operand.vmem [shape: f32[128,128], index: 1, kind: input, shape index: {}]   ;;  %s1651_s2 = inlined_call_operand.vmem [shape: f32[1,128], index: 2, kind: input, shape index: {}]   ;;  %s1652_s3 = inlined_call_operand.vmem [shape: f32[128,128], index: 3, kind: input, shape index: {}]   ;;  %s1653_s4 = inlined_call_operand.vmem [shape: f32[1,128], index: 4, kind: input, shape index: {}]   ;;  %s1654_s5 = inlined_call_operand.vmem [shape: f32[128,128], index: 5, kind: input, shape index: {}]   ;;  %s1655_s6 = inlined_call_operand.vmem [shape: f32[1,128], index: 6, kind: input, shape index: {}]   ;;  %s1656_s7 = inlined_call_operand.vmem [shape: f32[128,128], index: 7, kind: input, shape index: {}]   ;;  %s1657_s8 = inlined_call_operand.vmem [shape: f32[1,128], index: 8, kind: input, shape index: {}]   ;;  %s1658_s9 = inlined_call_operand.vmem [shape: f32[128,128], index: 9, kind: input, shape index: {}]   ;;  %s1659_s10 = inlined_call_operand.vmem [shape: f32[1,128], index: 10, kind: input, shape index: {}]   ;;  %s1660_s11 = inlined_call_operand.vmem [shape: f32[1,128], index: 11, kind: input, shape index: {}]   ;;  %s1661_s12 = inlined_call_operand.vmem [shape: f32[1,128], index: 12, kind: input, shape index: {}]   ;;  %s1662_s13 = inlined_call_operand.vmem [shape: f32[1,128], index: 13, kind: input, shape index: {}]   ;;  %s1663_s14 = inlined_call_operand.vmem [shape: f32[1,128], index: 14, kind: input, shape index: {}]   ;;  %s1664_s15 = inlined_call_operand.hbm [shape: f32[8,128], index: 15, kind: output, shape index: {}]  }
   0x1   :  { %v148_v0 = vld [vmem:[%s1652_s3] sm:$0xff]  ;;  %v149_v1 = vld [vmem:[%s1652_s3 + $0x8] sm:$0xff]  ;;  %1069 = vmatprep.subr.bf16.mxu1 %v1201_v3  ;;  %1045 = vmatprep.subr.bf16.mxu0 %v1201_v3  ;;  %v150_v6 = vld [vmem:[%s1652_s3 + $0x10] sm:$0xff] }
   0x2   :  { %v55_v2 = vld [vmem:[%s1650_s1] sm:$0xff]  ;;  %v1070_v4 = vpack.c.bf16 %v149_v1, %v148_v0  ;;  %v56_v5 = vld [vmem:[%s1650_s1 + $0x8] sm:$0xff]  ;;  %v151_v7 = vld [vmem:[%s1652_s3 + $0x18] sm:$0xff]  ;;  %927 = vmatprep.mubr.msk.f32.mxu1 %vm1202_vm0, %v1203_v11  ;;  %892 = vmatprep.mubr.msk.f32.mxu0 %vm1202_vm0, %v1203_v11 }
   0x3   :  { %v1046_v8 = vpack.c.bf16 %v56_v5, %v55_v2  ;;  %v57_v9 = vld [vmem:[%s1650_s1 + $0x10] sm:$0xff]  ;;  %v58_v10 = vld [vmem:[%s1650_s1 + $0x18] sm:$0xff]  ;;  %v1073_v12 = vpack.c.bf16 %v151_v7, %v150_v6  ;;  %v152_v14 = vld [vmem:[%s1652_s3 + $0x20] sm:$0xff] }
   0x4   :  { %1071 = vmatpush3.bf16.msra.mxu1 %v1070_v4  ;;  %v1049_v13 = vpack.c.bf16 %v58_v10, %v57_v9  ;;  %v153_v15 = vld [vmem:[%s1652_s3 + $0x28] sm:$0xff]  ;;  %v59_v16 = vld [vmem:[%s1650_s1 + $0x20] sm:$0xff]  ;;  %v154_v20 = vld [vmem:[%s1652_s3 + $0x30] sm:$0xff] }
   0x5   :  { %1047 = vmatpush3.bf16.msra.mxu0 %v1046_v8  ;;  %1072 = vmatprep.subr.bf16.mxu1 %v1201_v3  ;;  %v60_v17 = vld [vmem:[%s1650_s1 + $0x28] sm:$0xff]  ;;  %v1076_v18 = vpack.c.bf16 %v153_v15, %v152_v14  ;;  %v155_v21 = vld [vmem:[%s1652_s3 + $0x38] sm:$0xff]  ;;  %v61_v22 = vld [vmem:[%s1650_s1 + $0x30] sm:$0xff] }
   0x6   :  { %1048 = vmatprep.subr.bf16.mxu0 %v1201_v3  ;;  %v1052_v19 = vpack.c.bf16 %v60_v17, %v59_v16  ;;  %v62_v23 = vld [vmem:[%s1650_s1 + $0x38] sm:$0xff]  ;;  %v1079_v24 = vpack.c.bf16 %v155_v21, %v154_v20 }
   0x8   :  { %1074 = vmatpush3.bf16.msra.mxu1 %v1073_v12 }
   0x9   :  { %1050 = vmatpush3.bf16.msra.mxu0 %v1049_v13  ;;  %1075 = vmatprep.subr.bf16.mxu1 %v1201_v3 }
   0xa   :  { %1051 = vmatprep.subr.bf16.mxu0 %v1201_v3 }
   0xc   :  { %1077 = vmatpush3.bf16.msra.mxu1 %v1076_v18 }
   0xd   :  { %20 = vsyncpa [#allocation3], 0  ;;  %1053 = vmatpush3.bf16.msra.mxu0 %v1052_v19  ;;  %1078 = vmatprep.subr.bf16.mxu1 %v1201_v3  ;;  %v1055_v25 = vpack.c.bf16 %v62_v23, %v61_v22  ;;  %v156_v26 = vld [vmem:[%s1652_s3 + $0x40] sm:$0xff]  ;;  %v157_v27 = vld [vmem:[%s1652_s3 + $0x48] sm:$0xff]  ;;  %vm405_vm1 = vcmask 64512   ;;  %s1204_s23 = smov [#allocation2]  }
   0xe   :  { %1054 = vmatprep.subr.bf16.mxu0 %v1201_v3  ;;  %v63_v28 = vld [vmem:[%s1650_s1 + $0x40] sm:$0xff]  ;;  %v64_v29 = vld [vmem:[%s1650_s1 + $0x48] sm:$0xff]  ;;  %v1082_v30 = vpack.c.bf16 %v157_v27, %v156_v26  ;;  %v158_v32 = vld [vmem:[%s1652_s3 + $0x50] sm:$0xff] }
   0xf   :  { %v1058_v31 = vpack.c.bf16 %v64_v29, %v63_v28  ;;  %v159_v33 = vld [vmem:[%s1652_s3 + $0x58] sm:$0xff]  ;;  %v65_v34 = vld [vmem:[%s1650_s1 + $0x50] sm:$0xff]  ;;  %v160_v38 = vld [vmem:[%s1652_s3 + $0x60] sm:$0xff] }
  0x10   :  { %1080 = vmatpush3.bf16.msra.mxu1 %v1079_v24  ;;  %v66_v35 = vld [vmem:[%s1650_s1 + $0x58] sm:$0xff]  ;;  %v1085_v36 = vpack.c.bf16 %v159_v33, %v158_v32  ;;  %v161_v39 = vld [vmem:[%s1652_s3 + $0x68] sm:$0xff]  ;;  %v67_v40 = vld [vmem:[%s1650_s1 + $0x60] sm:$0xff] }
  0x11   :  { %1056 = vmatpush3.bf16.msra.mxu0 %v1055_v25  ;;  %1081 = vmatprep.subr.bf16.mxu1 %v1201_v3  ;;  %v1061_v37 = vpack.c.bf16 %v66_v35, %v65_v34  ;;  %v68_v41 = vld [vmem:[%s1650_s1 + $0x68] sm:$0xff]  ;;  %v1088_v42 = vpack.c.bf16 %v161_v39, %v160_v38  ;;  %v162_v44 = vld [vmem:[%s1652_s3 + $0x70] sm:$0xff]  ;;  %v163_v45 = vld [vmem:[%s1652_s3 + $0x78] sm:$0xff] }
  0x12   :  { %1057 = vmatprep.subr.bf16.mxu0 %v1201_v3  ;;  %v1064_v43 = vpack.c.bf16 %v68_v41, %v67_v40  ;;  %v69_v46 = vld [vmem:[%s1650_s1 + $0x70] sm:$0xff]  ;;  %v70_v47 = vld [vmem:[%s1650_s1 + $0x78] sm:$0xff]  ;;  %v1091_v48 = vpack.c.bf16 %v163_v45, %v162_v44  ;;  %v1404_v50 = vld [vmem:[%s1649_s0] sm:$0xff]  ;;  %s753_s0 = sshll.u32 %s1204_s23, 4  ;;  %s754_s0 = int_to_ptr.vmem [resolvable:$true] %s753_s0 }
  0x13   :  { %v1067_v49 = vpack.c.bf16 %v70_v47, %v69_v46  ;;  %v241_v51 = vld [vmem:[%s1654_s5] sm:$0xff]  ;;  %v242_v52 = vld [vmem:[%s1654_s5 + $0x8] sm:$0xff]  ;;  %v243_v53 = vld [vmem:[%s1654_s5 + $0x10] sm:$0xff]  ;;  %s1177_s24 = scalar_lea.vmem %s754_s0, 128  ;;  %p1182_p1 = scmp.lt.s32.totalorder %s754_s0, %s754_s0 }
  0x14   :  { %1083 = vmatpush3.bf16.msra.mxu1 %v1082_v30  ;;  %v1094_v54 = vpack.c.bf16 %v242_v52, %v241_v51  ;;  %v244_v55 = vld [vmem:[%s1654_s5 + $0x18] sm:$0xff]  ;;  %v245_v57 = vld [vmem:[%s1654_s5 + $0x20] sm:$0xff]  ;;  %v246_v58 = vld [vmem:[%s1654_s5 + $0x28] sm:$0xff]  ;;  %p1178_p0 = scmp.ne.s32.totalorder %s754_s0, %s1177_s24  ;;  %p1183_p2 = scmp.lt.s32.totalorder %s1177_s24, %s1177_s24 }
  0x15   :  { %1059 = vmatpush3.bf16.msra.mxu0 %v1058_v31  ;;  %1084 = vmatprep.subr.bf16.mxu1 %v1201_v3  ;;  %v1097_v56 = vpack.c.bf16 %v244_v55, %v243_v53  ;;  %v1100_v59 = vpack.c.bf16 %v246_v58, %v245_v57  ;;  %v247_v60 = vld [vmem:[%s1654_s5 + $0x30] sm:$0xff]  ;;  %v248_v61 = vld [vmem:[%s1654_s5 + $0x38] sm:$0xff]  ;;  %v249_v63 = vld [vmem:[%s1654_s5 + $0x40] sm:$0xff] }
  0x16   :  { %1060 = vmatprep.subr.bf16.mxu0 %v1201_v3  ;;  %v1103_v62 = vpack.c.bf16 %v248_v61, %v247_v60  ;;  %v250_v0 = vld [vmem:[%s1654_s5 + $0x48] sm:$0xff]  ;;  %v251_v2 = vld [vmem:[%s1654_s5 + $0x50] sm:$0xff]  ;;  %v252_v4 = vld [vmem:[%s1654_s5 + $0x58] sm:$0xff]  ;;  %p1184_p3 = por %p1183_p2, %p1182_p1 }
  0x17   :  { %v1106_v1 = vpack.c.bf16 %v250_v0, %v249_v63  ;;  %v1109_v5 = vpack.c.bf16 %v252_v4, %v251_v2  ;;  %v253_v6 = vld [vmem:[%s1654_s5 + $0x60] sm:$0xff]  ;;  %v254_v7 = vld [vmem:[%s1654_s5 + $0x68] sm:$0xff]  ;;  %v255_v9 = vld [vmem:[%s1654_s5 + $0x70] sm:$0xff] }
  0x18   :  { %1086 = vmatpush3.bf16.msra.mxu1 %v1085_v36  ;;  %v1112_v8 = vpack.c.bf16 %v254_v7, %v253_v6  ;;  %v256_v10 = vld [vmem:[%s1654_s5 + $0x78] sm:$0xff]  ;;  %v762_v13 = vld [vmem:[%s1653_s4] ss:$0 sm:$0xff]  ;;  %v529_v46 = vld [vmem:[%s1656_s7 + $0x8] sm:$0xff]  ;;  %p1185_p4 = pnand %p1184_p3, %p1178_p0 }
  0x19   :  { %1062 = vmatpush3.bf16.msra.mxu0 %v1061_v37  ;;  %1087 = vmatprep.subr.bf16.mxu1 %v1201_v3  ;;  %v1115_v12 = vpack.c.bf16 %v256_v10, %v255_v9  ;;  %v761_v14 = vld [vmem:[%s1651_s2] ss:$0 sm:$0xff]  ;;  %v493_v37 = vlaneseq  ;;  %v530_v47 = vld [vmem:[%s1656_s7 + $0x10] sm:$0xff]  ;;  %v533_v53 = vld [vmem:[%s1656_s7 + $0x28] sm:$0xff] }
  0x1a   :  { %1063 = vmatprep.subr.bf16.mxu0 %v1201_v3  ;;  %v763_v25 = vld [vmem:[%s1655_s6] ss:$0 sm:$0xff]  ;;  %v534_v60 = vld [vmem:[%s1656_s7 + $0x30] sm:$0xff]  ;;  %v535_v61 = vld [vmem:[%s1656_s7 + $0x38] sm:$0xff] }
  0x1b   :  { %v1491_v39 = vand.u32 127, %v493_v37  ;;  %v532_v52 = vld [vmem:[%s1656_s7 + $0x20] sm:$0xff]  ;;  %v537_v0 = vld [vmem:[%s1656_s7 + $0x48] sm:$0xff]  ;;  %v538_v2 = vld [vmem:[%s1656_s7 + $0x50] sm:$0xff] }
  0x1c   :  { %1089 = vmatpush3.bf16.msra.mxu1 %v1088_v42  ;;  %v536_v63 = vld [vmem:[%s1656_s7 + $0x40] sm:$0xff]  ;;  %v539_v4 = vld [vmem:[%s1656_s7 + $0x58] sm:$0xff]  ;;  %v541_v7 = vld [vmem:[%s1656_s7 + $0x68] sm:$0xff] }
  0x1d   :  { %1065 = vmatpush3.bf16.msra.mxu0 %v1064_v43  ;;  %1090 = vmatprep.subr.bf16.mxu1 %v1201_v3  ;;  %vm495_vm2 = vcmp.lt.s32.totalorder %v1491_v39, 32  ;;  %v540_v6 = vld [vmem:[%s1656_s7 + $0x60] sm:$0xff]  ;;  %v542_v9 = vld [vmem:[%s1656_s7 + $0x70] sm:$0xff]  ;;  %v543_v10 = vld [vmem:[%s1656_s7 + $0x78] sm:$0xff] }
  0x1e   :  { %1066 = vmatprep.subr.bf16.mxu0 %v1201_v3 }
  0x20   :  { %1092 = vmatpush3.bf16.msra.mxu1 %v1091_v48 }
  0x21   :  { %1068 = vmatpush3.bf16.msra.mxu0 %v1067_v49  ;;  %965 = vmatprep.subr.mxu1 %v1203_v11  ;;  %v531_v49 = vld [vmem:[%s1656_s7 + $0x18] sm:$0xff] }
  0x22   :  { %1093 = vmatprep.subr.bf16.mxu0 %v1201_v3  ;;  %v1121_v51 = vpack.c.bf16 %v531_v49, %v530_v47 }
  0x23   :  { %928 = vmatmul.mubr.f32.vlgmr.msra.gmra.mrb[0].mxu1 %v1404_v50 }
  0x24   :  { %893 = vmatmul.mubr.f32.vlgmr.msra.gmra.mrb[0].mxu0 %v1404_v50  ;;  %967 = vmatprep.mubr.msk.f32.mxu1 %vm1202_vm0, %v1203_v11 }
  0x25   :  { %962 = vmatprep.mubr.msk.f32.mxu0 %vm1202_vm0, %v1203_v11  ;;  %1095 = vmatpush3.bf16.msra.mxu0 %v1094_v54  ;;  %v1124_v54 = vpack.c.bf16 %v533_v53, %v532_v52 }
  0x26   :  { %1096 = vmatprep.subr.bf16.mxu0 %v1201_v3 }
  0x29   :  { %1098 = vmatpush3.bf16.msra.mxu0 %v1097_v56 }
  0x2a   :  { %1099 = vmatprep.subr.bf16.mxu0 %v1201_v3 }
  0x2d   :  { %1101 = vmatpush3.bf16.msra.mxu0 %v1100_v59 }
  0x2e   :  { %1102 = vmatprep.subr.bf16.mxu0 %v1201_v3 }
  0x31   :  { %1104 = vmatpush3.bf16.msra.mxu0 %v1103_v62  ;;  %v1127_v62 = vpack.c.bf16 %v535_v61, %v534_v60 }
  0x32   :  { %1105 = vmatprep.subr.bf16.mxu0 %v1201_v3 }
  0x35   :  { %1107 = vmatpush3.bf16.msra.mxu0 %v1106_v1  ;;  %v1130_v1 = vpack.c.bf16 %v537_v0, %v536_v63 }
  0x36   :  { %1108 = vmatprep.subr.bf16.mxu0 %v1201_v3 }
  0x39   :  { %1110 = vmatpush3.bf16.msra.mxu0 %v1109_v5  ;;  %v1133_v5 = vpack.c.bf16 %v539_v4, %v538_v2  ;;  %v769_v2 = vld [vmem:[%s1662_s13] ss:$0 sm:$0xff] }
  0x3a   :  { %1111 = vmatprep.subr.bf16.mxu0 %v1201_v3 }
  0x3d   :  { %1113 = vmatpush3.bf16.msra.mxu0 %v1112_v8  ;;  %v1136_v8 = vpack.c.bf16 %v541_v7, %v540_v6 }
  0x3e   :  { %1114 = vmatprep.subr.bf16.mxu0 %v1201_v3 }
  0x41   :  { %1116 = vmatpush3.bf16.msra.mxu0 %v1115_v12  ;;  %v1139_v12 = vpack.c.bf16 %v543_v10, %v542_v9 }
  0x42   :  { %1141 = vmatprep.subr.bf16.mxu0 %v1201_v3 }
  0x44   :  { %963 = vmatmul.mubr.f32.vlgmr.msra.gmra.mrb[2].mxu0 %v1404_v50 }
  0x45   :  { %1042 = vmatprep.mubr.msk.f32.mxu0 %vm1202_vm0, %v1203_v11 }
  0xf6   :  { %v237_v15 = vpop.f32.mrb[0].mxu1 }
  0xf7   :  { %v238_v16 = vadd.f32 %v762_v13, %v237_v15  ;;  %v929_v17 = vpop.f32.mrb[1].mxu1  ;;  %v144_v18 = vpop.f32.mrb[0].mxu0  ;;  %v622_v13 = vld [vmem:[%s1658_s9] sm:$0xff]  ;;  %v624_v15 = vld [vmem:[%s1658_s9 + $0x10] sm:$0xff] }
  0xf8   :  { %v145_v19 = vadd.f32 %v761_v14, %v144_v18  ;;  %v894_v20 = vpop.f32.mrb[1].mxu0  ;;  %v623_v14 = vld [vmem:[%s1658_s9 + $0x8] sm:$0xff]  ;;  %v625_v17 = vld [vmem:[%s1658_s9 + $0x18] sm:$0xff] }
  0xf9   :  { %966 = vmatpush3.xpose.msra.mxu1 %v238_v16  ;;  %v1142_v16 = vpack.c.bf16 %v623_v14, %v622_v13  ;;  %v1145_v18 = vpack.c.bf16 %v625_v17, %v624_v15  ;;  %v627_v20 = vld [vmem:[%s1658_s9 + $0x28] sm:$0xff] }
  0xfa   :  { %970 = vmatprep.subr.mxu1 %v1203_v11 }
  0xfb   :  { %1143 = vmatpush3.bf16.msra.mxu0 %v1142_v16 }
  0xfc   :  { %968 = vmatmul.mubr.f32.vlgmr.msra.gmra.mrb[2].mxu1 %v145_v19  ;;  %1144 = vmatprep.subr.bf16.mxu0 %v1201_v3  ;;  %v626_v19 = vld [vmem:[%s1658_s9 + $0x20] sm:$0xff] }
  0xfd   :  { %972 = vmatprep.mubr.msk.f32.mxu1 %vm1202_vm0, %v1203_v11 }
  0xff   :  { %1146 = vmatpush3.bf16.msra.mxu0 %v1145_v18 }
 0x100   :  { %1147 = vmatprep.subr.bf16.mxu0 %v1201_v3 }
 0x117   :  { %v330_v26 = vpop.f32.mrb[2].mxu0 }
 0x118   :  { %v331_v27 = vadd.f32 %v763_v25, %v330_v26  ;;  %v964_v28 = vpop.f32.mrb[3].mxu0  ;;  %v630_v25 = vld [vmem:[%s1658_s9 + $0x40] sm:$0xff]  ;;  %v631_v26 = vld [vmem:[%s1658_s9 + $0x48] sm:$0xff] }
 0x119   :  { %v632_v28 = vld [vmem:[%s1658_s9 + $0x50] sm:$0xff] }
 0x11a   :  { %971 = vmatpush3.msra.mxu1 %v331_v27  ;;  %v1154_v27 = vpack.c.bf16 %v631_v26, %v630_v25 }
 0x11b   :  { %1117 = vmatprep.subr.bf16.mxu1 %v1201_v3 }
 0x1cf   :  { %v400_v21 = vpop.f32.mrb[2].mxu1 }
 0x1d0   :  { %v404_v22 = vmul.f32 0.17677669, %v400_v21  ;;  %v969_v23 = vpop.f32.mrb[3].mxu1  ;;  %v1148_v21 = vpack.c.bf16 %v627_v20, %v626_v19 }
 0x1d1   :  { %v629_v23 = vld [vmem:[%s1658_s9 + $0x38] sm:$0xff] }
 0x1d2   :  { %v406_v24 = vsel %vm405_vm1, %v404_v22, -inf  ;;  %1149 = vmatpush3.bf16.msra.mxu0 %v1148_v21 }
 0x1d3   :  { %407 = vmax.xlane.f32.xlu0 %v406_v24  ;;  %1150 = vmatprep.subr.bf16.mxu0 %v1201_v3 }
 0x260   :  { %v408_v29 = vpop.xlane.xlu0 %407 }
 0x261   :  { %v409_v30 = vsub.f32 %v404_v22, %v408_v29  ;;  %v628_v22 = vld [vmem:[%s1658_s9 + $0x30] sm:$0xff]  ;;  %v633_v29 = vld [vmem:[%s1658_s9 + $0x58] sm:$0xff] }
 0x262   :  { %v1151_v24 = vpack.c.bf16 %v629_v23, %v628_v22 }
 0x263   :  { %v410_v31 = vmul.f32 1.442695, %v409_v30  ;;  %v1157_v30 = vpack.c.bf16 %v633_v29, %v632_v28 }
 0x264   :  { %1152 = vmatpush3.bf16.msra.mxu0 %v1151_v24 }
 0x265   :  { %1169 = vpow2.f32 %v410_v31  ;;  %1153 = vmatprep.subr.bf16.mxu0 %v1201_v3  ;;  %v634_v31 = vld [vmem:[%s1658_s9 + $0x60] sm:$0xff] }
 0x268   :  { %1155 = vmatpush3.bf16.msra.mxu0 %v1154_v27 }
 0x269   :  { %1156 = vmatprep.subr.bf16.mxu0 %v1201_v3 }
 0x26c   :  { %1158 = vmatpush3.bf16.msra.mxu0 %v1157_v30 }
 0x26d   :  { %1159 = vmatprep.subr.bf16.mxu0 %v1201_v3 }
 0x26f   :  { %v1170_v32 = vpop.eup %1169 }
 0x270   :  { %973 = vmatmul.mubr.msk.f32.vlgmr.msra.gmra.mrb[4].mxu1 %vm405_vm1, %v1170_v32  ;;  %v412_v33 = vsel %vm405_vm1, %v1170_v32, 0.0  ;;  %v635_v32 = vld [vmem:[%s1658_s9 + $0x68] sm:$0xff] }
 0x271   :  { %413 = vadd.xlane.f32.xlu0 %v412_v33  ;;  %1007 = vmatprep.mubr.msk.f32.mxu1 %vm1202_vm0, %v1203_v11  ;;  %v528_v11 = vld [vmem:[%s1656_s7] sm:$0xff]  ;;  %v1160_v33 = vpack.c.bf16 %v635_v32, %v634_v31 }
 0x272   :  { %v1118_v48 = vpack.c.bf16 %v529_v46, %v528_v11  ;;  %v767_v11 = vld [vmem:[%s1657_s8] ss:$0 sm:$0xff] }
 0x273   :  { %1161 = vmatpush3.bf16.msra.mxu0 %v1160_v33 }
 0x274   :  { %1119 = vmatpush3.bf16.msra.mxu1 %v1118_v48  ;;  %1162 = vmatprep.subr.bf16.mxu0 %v1201_v3 }
 0x275   :  { %1120 = vmatprep.subr.bf16.mxu1 %v1201_v3 }
 0x278   :  { %1122 = vmatpush3.bf16.msra.mxu1 %v1121_v51  ;;  %v768_v51 = vld [vmem:[%s1659_s10] ss:$0 sm:$0xff] }
 0x279   :  { %1123 = vmatprep.subr.bf16.mxu1 %v1201_v3 }
 0x27c   :  { %1125 = vmatpush3.bf16.msra.mxu1 %v1124_v54 }
 0x27d   :  { %1126 = vmatprep.subr.bf16.mxu1 %v1201_v3 }
 0x280   :  { %1128 = vmatpush3.bf16.msra.mxu1 %v1127_v62 }
 0x281   :  { %1129 = vmatprep.subr.bf16.mxu1 %v1201_v3 }
 0x284   :  { %1131 = vmatpush3.bf16.msra.mxu1 %v1130_v1 }
 0x285   :  { %1132 = vmatprep.subr.bf16.mxu1 %v1201_v3 }
 0x288   :  { %1134 = vmatpush3.bf16.msra.mxu1 %v1133_v5  ;;  %v770_v5 = vld [vmem:[%s1663_s14] ss:$0 sm:$0xff] }
 0x289   :  { %1135 = vmatprep.subr.bf16.mxu1 %v1201_v3 }
 0x28c   :  { %1137 = vmatpush3.bf16.msra.mxu1 %v1136_v8 }
 0x28d   :  { %1138 = vmatprep.subr.bf16.mxu1 %v1201_v3  ;;  %v636_v3 = vld [vmem:[%s1658_s9 + $0x70] sm:$0xff] }
 0x290   :  { %1140 = vmatpush3.bf16.msra.mxu1 %v1139_v12 }
 0x2fe   :  { %v414_v34 = vpop.xlane.xlu0 %413 }
 0x2ff   :  { %1171 = vrcp.f32 %v414_v34 }
 0x309   :  { %v1172_v35 = vpop.eup %1171 }
 0x30a   :  { %v489_v36 = vmul.f32 %v1172_v35, %v414_v34 }
 0x30c   :  { %v490_v38 = vsub.f32 2.0, %v489_v36 }
 0x30e   :  { %v491_v40 = vmul.f32 %v1172_v35, %v490_v38  ;;  %v765_v38 = vld [vmem:[%s1660_s11] ss:$0 sm:$0xff] }
 0x343   :  { %v484_v41 = vpop.f32.mrb[4].mxu1 }
 0x344   :  { %v492_v42 = vmul.f32 %v491_v40, %v484_v41  ;;  %v974_v43 = vpop.f32.mrb[5].mxu1  ;;  %v766_v41 = vld [vmem:[%s1661_s12] ss:$0 sm:$0xff] }
 0x346   :  { %v496_v44 = vadd.f32 %v492_v42, %v1404_v50 }
 0x348   :  { %v501_v45 = vsel %vm495_vm2, %v496_v44, 0.0 }
 0x349   :  { %502 = vadd.xlane.f32.xlu1 %v501_v45 }
 0x3d6   :  { %v503_v55 = vpop.xlane.xlu1 %502 }
 0x3d7   :  { %v504_v56 = vmul.f32 0.03125, %v503_v55 }
 0x3d9   :  { %v505_v57 = vsub.f32 %v496_v44, %v504_v56  ;;  %v637_v44 = vld [vmem:[%s1658_s9 + $0x78] sm:$0xff] }
 0x3da   :  { %v1163_v45 = vpack.c.bf16 %v637_v44, %v636_v3 }
 0x3db   :  { %v1520_v58 = vsel %vm495_vm2, %v505_v57, 0.0 }
 0x3dc   :  { %v507_v59 = vmul.f32 %v1520_v58, %v1520_v58  ;;  %1164 = vmatpush3.bf16.msra.mxu0 %v1163_v45 }
 0x3de   :  { %508 = vadd.xlane.f32.xlu1 %v507_v59 }
 0x46b   :  { %v509_v34 = vpop.xlane.xlu1 %508 }
 0x46c   :  { %v510_v35 = vmul.f32 0.03125, %v509_v34 }
 0x46e   :  { %v511_v36 = vadd.f32 1e-05, %v510_v35 }
 0x470   :  { %1173 = vrsqrt.f32 %v511_v36 }
 0x47a   :  { %v1174_v37 = vpop.eup %1173 }
 0x47b   :  { %v513_v40 = vmul.f32 %v1174_v37, %v1520_v58 }
 0x47d   :  { %v520_v42 = vmul.f32 %v765_v38, %v513_v40 }
 0x47f   :  { %v527_v43 = vadd.f32 %v766_v41, %v520_v42 }
 0x481   :  { %1008 = vmatmul.mubr.f32.vlgmr.msra.gmra.mrb[6].mxu1 %v527_v43 }
 0x554   :  { %v617_v46 = vpop.f32.mrb[6].mxu1 }
 0x555   :  { %v618_v47 = vadd.f32 %v767_v11, %v617_v46  ;;  %v1009_v48 = vpop.f32.mrb[7].mxu1 }
 0x557   :  { %v621_v49 = vmax.f32 %v618_v47, 0.0 }
 0x559   :  { %1043 = vmatmul.mubr.f32.vlgmr.msra.gmra.mrb[4].mxu0 %v621_v49 }
 0x62c   :  { %v711_v52 = vpop.f32.mrb[4].mxu0 }
 0x62d   :  { %v712_v53 = vadd.f32 %v768_v51, %v711_v52  ;;  %v1044_v54 = vpop.f32.mrb[5].mxu0 }
 0x62f   :  { %v715_v55 = vadd.f32 %v712_v53, %v527_v43 }
 0x631   :  { %v718_v56 = vsel %vm495_vm2, %v715_v55, 0.0 }
 0x632   :  { %719 = vadd.xlane.f32.xlu0 %v718_v56 }
 0x6bf   :  { %v720_v57 = vpop.xlane.xlu0 %719 }
 0x6c0   :  { %v721_v58 = vmul.f32 0.03125, %v720_v57 }
 0x6c2   :  { %v722_v59 = vsub.f32 %v715_v55, %v721_v58 }
 0x6c4   :  { %v723_v60 = vsel %vm495_vm2, %v722_v59, 0.0 }
 0x6c5   :  { %v724_v61 = vmul.f32 %v723_v60, %v723_v60 }
 0x6c7   :  { %725 = vadd.xlane.f32.xlu1 %v724_v61 }
 0x754   :  { %v726_v62 = vpop.xlane.xlu1 %725 }
 0x755   :  { %v727_v63 = vmul.f32 0.03125, %v726_v62 }
 0x757   :  { %v728_v0 = vadd.f32 1e-05, %v727_v63 }
 0x759   :  { %1175 = vrsqrt.f32 %v728_v0 }
 0x763   :  { %v1176_v1 = vpop.eup %1175 }
 0x764   :  { %v730_v4 = vmul.f32 %v1176_v1, %v723_v60 }
 0x766   :  { %v737_v6 = vmul.f32 %v769_v2, %v730_v4 }
 0x768   :  { %v744_v39 = vadd.f32 %v770_v5, %v737_v6 }
 0x76a   :  { %v745_v7 = vadd.f32 %v744_v39, %v1404_v50 }
 0x76c   :  { %746 = vst [vmem:[#allocation2] sm:$0xff] %v745_v7 }
 0x76d   :  { %1188 = shalt.err (!%p1185_p4)
}
 0x76e   :  { %s1189_s26 = scalar_lea.hbm %s1664_s15, 128 }
 0x76f   :  { %p1190_p5 = scmp.ne.s32.totalorder %s1664_s15, %s1189_s26  ;;  %p1193_p6 = scmp.lt.u32.totalorder %s1189_s26, %s1664_s15 }
 0x771   :  { %p1195_p7 = pnand %p1193_p6, %p1190_p5 }
 0x773   :  { %1198 = shalt.err (!%p1195_p7)
}
 0x774   :  { %756 = dma.vmem_to_hbm [thread:$0]  %s754_s0, 128, %s1664_s15, [#allocation3]  }
 0x775   :  { %1199 = dma.done.wait [#allocation3], 128  }
 0x776   :  { %1200 = vsyncadd [#allocation3], 4294967168 }
 0x777   :  { %760 = vsyncpa [#allocation3], 1 }

</bundles_post_ra>
